<compile_context>
chip_gen: v7x
topology: tpu7x:2x2x1
jax: 0.10.0
libtpu: 0.0.40
codegen_flags: <defaults>
</compile_context>

<pallas_src>
import functools

import jax
import jax.numpy as jnp
from jax import lax
from jax.experimental import pallas as pl
from jax.experimental.pallas import tpu as pltpu

NUM_EXPERTS = 4
TOP_K = 2
HIDDEN = 32
LANES = 128


def _ceil_div(a, b):
    return -(-a // b)


def _round_up(a, b):
    return _ceil_div(a, b) * b


def moe_kernel(x_ref, w_ref, b_ref, o_ref, *, num_experts, top_k):
    # x_ref : [R, PW]        PW = pack*H = 128 lane-packed tokens (pack per row)
    # w_ref : [PW, 2*E*PW]   fused block-diagonal weights (see fuse_moe_params)
    # b_ref : [1,  2*E*PW]   fused bias
    # o_ref : [R, PW]        lane-packed outputs
    pw = x_ref.shape[-1]

    x = x_ref[...]  # native (bf16) dtype; MXU accumulates in f32

    # One lane-dense MXU matmul: every expert output AND every (replicated)
    # gating logit for all packed token slots.
    h = jnp.dot(x, w_ref[...], preferred_element_type=jnp.float32) + b_ref[...]

    # All slices below start at multiples of 128 lanes and are 128 wide ->
    # whole-vreg views, zero XLU rotate cost.
    h_e = [h[:, e * pw:(e + 1) * pw] for e in range(num_experts)]
    l_e = [h[:, (num_experts + e) * pw:(num_experts + e + 1) * pw]
           for e in range(num_experts)]

    # Softmax over experts.  The expert axis lives in separate 128-lane tiles,
    # so the per-token max / sum are plain elementwise max / add (VPU), and the
    # result is automatically replicated across each token's 32 hidden lanes.
    m = l_e[0]
    for e in range(1, num_experts):
        m = jnp.maximum(m, l_e[e])
    p_e = [jnp.exp(l - m) for l in l_e]                    # EUP
    denom = p_e[0]
    for e in range(1, num_experts):
        denom = denom + p_e[e]
    # approx reciprocal -> EUP slot; ~2^-12 rel. error, does not affect routing
    inv = pl.reciprocal(denom, approx=True)

    # Top-k gate mask + combine, fully elementwise.  rank[e] = number of
    # experts that beat expert e (ties -> lower index wins, like lax.top_k);
    # keep iff rank < top_k.  gate is already lane-aligned with h_e, so the
    # combine is just mul + add of 128-lane tiles.
    out = jnp.zeros(o_ref.shape, jnp.float32)
    for e in range(num_experts):
        rank = jnp.zeros(p_e[e].shape, jnp.int32)
        for o in range(num_experts):
            if o == e:
                continue
            beats = (p_e[o] >= p_e[e]) if o < e else (p_e[o] > p_e[e])
            rank = rank + beats.astype(jnp.int32)
        gate = jnp.where(rank < top_k, p_e[e] * inv, 0.0)
        out = out + gate * h_e[e]
    o_ref[...] = out.astype(o_ref.dtype)


def fuse_moe_params(wg, bg, we, be, *, pack, dtype=jnp.bfloat16):
    """One-time weight fusion (hoisted out of the forward pass).

    Column layout of the fused weight (PW = pack*H, expert-major):
      cols [e*PW, (e+1)*PW)              expert e: block-diag over the `pack`
                                         token slots of we[e]  -> outputs at
                                         lane i*H + j for token slot i
      cols [(E+e)*PW, (E+e+1)*PW)        expert e's gating column wg[:, e],
                                         replicated H times per token slot so
                                         the logit lands on every hidden lane
    """
    num_experts, h, h_out = we.shape
    assert h_out == h, "experts are Linear(H, H)"
    eye = jnp.eye(pack, dtype=jnp.float32)
    we32 = we.astype(jnp.float32)
    wg32 = wg.astype(jnp.float32)

    w_exp = jnp.concatenate(
        [jnp.kron(eye, we32[e]) for e in range(num_experts)], axis=1)
    rep = jnp.ones((1, h), jnp.float32)
    w_gate = jnp.concatenate(
        [jnp.kron(eye, wg32[:, e:e + 1] * rep) for e in range(num_experts)], axis=1)
    w_fused = jnp.concatenate([w_exp, w_gate], axis=1).astype(dtype)   # [PW, 2*E*PW]

    be32 = be.astype(jnp.float32)
    bg32 = bg.reshape(-1).astype(jnp.float32)
    b_exp = jnp.concatenate([jnp.tile(be32[e], pack) for e in range(num_experts)])
    b_gate = jnp.concatenate(
        [jnp.full((pack * h,), bg32[e], jnp.float32) for e in range(num_experts)])
    b_fused = jnp.concatenate([b_exp, b_gate]).reshape(1, -1).astype(dtype)
    return w_fused, b_fused


def moe_forward(x, w_fused, b_fused, *, top_k=TOP_K, max_rows_per_tile=512):
    """x: [N, H]; w_fused/b_fused from fuse_moe_params.  Returns [N, H]."""
    n, h = x.shape
    pw, cols = w_fused.shape
    pack = pw // h
    num_experts = cols // (2 * pw)
    assert pw == pack * h and cols == 2 * num_experts * pw

    # ---- lane-pack `pack` tokens per row (contiguous reshape, free) ---------
    rows = _ceil_div(n, pack)
    # Row-tile selection: as large as possible (amortize ~0.35us/step pipeline
    # overhead) but keep >= 2 grid steps when there is enough work so the
    # "parallel" axis engages both v7x TensorCores; rows stay multiples of 8.
    if rows <= 8:
        row_tile, n_tiles = 8, 1            # too little work to split across cores
    else:
        n_tiles = max(2, _ceil_div(rows, max_rows_per_tile))
        row_tile = _round_up(_ceil_div(rows, n_tiles), 8)
        n_tiles = _ceil_div(rows, row_tile)
    rows_pad = row_tile * n_tiles
    n_pad = rows_pad * pack

    x_p = jnp.pad(x, ((0, n_pad - n), (0, 0))) if n_pad != n else x
    x_p = x_p.reshape(rows_pad, pw)

    kernel = functools.partial(moe_kernel, num_experts=num_experts, top_k=top_k)

    out_p = pl.pallas_call(
        kernel,
        out_shape=jax.ShapeDtypeStruct((rows_pad, pw), x.dtype),
        grid_spec=pltpu.PrefetchScalarGridSpec(
            num_scalar_prefetch=0,
            grid=(n_tiles,),
            in_specs=[
                pl.BlockSpec((row_tile, pw), lambda i: (i, 0)),      # packed x tile
                # Grid-invariant fused weights / bias (constant index_map ->
                # DMA'd once and kept resident).
                # TODO(synk): at production H (thousands) single-buffer these
                # (pipeline_mode=pl.Buffered(1)), add an "arbitrary" grid axis
                # over the fused output columns with a VMEM accumulator, and
                # raise vmem_limit_bytes so the resident weights fit v7x's
                # 64 MiB VMEM.
                pl.BlockSpec((pw, cols), lambda i: (0, 0)),          # fused W
                pl.BlockSpec((1, cols), lambda i: (0, 0)),           # fused b
            ],
            out_specs=pl.BlockSpec((row_tile, pw), lambda i: (i, 0)),
        ),
        compiler_params=pltpu.CompilerParams(
            dimension_semantics=("parallel",),          # token axis -> both v7x TCs
            vmem_limit_bytes=32 * 1024 * 1024,
        ),
    )(x_p, w_fused, b_fused)

    return out_p.reshape(n_pad, h)[:n]


def moe_reference(x, wg, bg, we, be, top_k=TOP_K):
    """Plain-JAX replica of the PyTorch forward (gather form), in f32."""
    f32 = jnp.float32
    x, wg, bg, we, be = (a.astype(f32) for a in (x, wg, bg, we, be))
    logits = jnp.dot(x, wg, precision=lax.Precision.HIGHEST) + bg.reshape(-1)
    probs = jax.nn.softmax(logits, axis=-1)
    vals, idx = lax.top_k(probs, top_k)
    out = jnp.zeros_like(x)
    for k in range(top_k):
        w_k = jnp.take(we, idx[:, k], axis=0)                       # [N, H, H]
        b_k = jnp.take(be, idx[:, k], axis=0)                       # [N, H]
        hk = jnp.einsum("nh,nhd->nd", x, w_k,
                        precision=lax.Precision.HIGHEST) + b_k
        out = out + vals[:, k][:, None] * hk
    return out


if __name__ == "__main__":
    key = jax.random.PRNGKey(0)
    k_x, k_wg, k_bg, k_we, k_be = jax.random.split(key, 5)

    batch, seq = 2, 8
    n_tokens = batch * seq                                           # 16 tokens
    x = jax.random.normal(k_x, (n_tokens, HIDDEN), jnp.float32)

    scale = 1.0 / jnp.sqrt(HIDDEN)
    wg = jax.random.normal(k_wg, (HIDDEN, NUM_EXPERTS), jnp.float32) * scale
    bg = jax.random.normal(k_bg, (NUM_EXPERTS,), jnp.float32) * 0.1
    we = jax.random.normal(k_we, (NUM_EXPERTS, HIDDEN, HIDDEN), jnp.float32) * scale
    be = jax.random.normal(k_be, (NUM_EXPERTS, HIDDEN), jnp.float32) * 0.1

    # Model dtype is bf16 (feedback: bf16 I/O for the streamed operands).  The
    # reference consumes the same bf16-rounded values so the comparison
    # isolates kernel error rather than input-quantization error.
    io_dtype = jnp.bfloat16
    x_bf, wg_bf, bg_bf, we_bf, be_bf = (
        a.astype(io_dtype) for a in (x, wg, bg, we, be))

    pack = LANES // HIDDEN                                           # 4 tokens / 128 lanes
    # One-time fusion at parameter-init time (hoisted out of the forward pass).
    w_fused, b_fused = fuse_moe_params(wg_bf, bg_bf, we_bf, be_bf,
                                       pack=pack, dtype=io_dtype)

    out = moe_forward(x_bf, w_fused, b_fused, top_k=TOP_K)
    out = jax.block_until_ready(out)

    ref = moe_reference(x_bf, wg_bf, bg_bf, we_bf, be_bf, top_k=TOP_K)
    assert out.shape == (n_tokens, HIDDEN)
    # tolerance covers bf16 output rounding + approximate reciprocal
    assert jnp.allclose(out.astype(jnp.float32), ref, rtol=2e-2, atol=2e-2), \
        "mismatch vs reference"
    print("KERNEL_OK")
</pallas_src>

<mosaic_0001>
module attributes {stable_mosaic.version = 11 : i64} {
  func.func @moe_kernel(%arg0: i32, %arg1: memref<8x128xbf16, #tpu.memory_space<vmem>>, %arg2: memref<128x1024xbf16, #tpu.memory_space<vmem>>, %arg3: memref<1x1024xbf16, #tpu.memory_space<vmem>>, %arg4: memref<8x128xbf16, #tpu.memory_space<vmem>>) attributes {dimension_semantics = [#tpu.dimension_semantics<parallel>], iteration_bounds = array<i64: 1>, scalar_prefetch = 0 : i64, scratch_operands = 0 : i64, tpu.core_type = #tpu.core_type<tc>, window_params = [{transform_indices = @transform_0, window_bounds = array<i64: 8, 128>}, {pipeline_mode = #tpu.pipeline_mode<synchronous>, transform_indices = @transform_1, window_bounds = array<i64: 128, 1024>}, {pipeline_mode = #tpu.pipeline_mode<synchronous>, transform_indices = @transform_2, window_bounds = array<i64: 1, 1024>}, {transform_indices = @transform_3, window_bounds = array<i64: 8, 128>}]} {
    %c0 = arith.constant 0 : index
    %c0_0 = arith.constant 0 : index
    %0 = vector.load %arg1[%c0, %c0_0] : memref<8x128xbf16, #tpu.memory_space<vmem>>, vector<8x128xbf16>
    %c0_1 = arith.constant 0 : index
    %c0_2 = arith.constant 0 : index
    %1 = vector.load %arg2[%c0_1, %c0_2] : memref<128x1024xbf16, #tpu.memory_space<vmem>>, vector<128x1024xbf16>
    %cst = arith.constant dense<0.000000e+00> : vector<8x1024xf32>
    %2 = tpu.matmul %0, %1, %cst {dimension_numbers = #tpu.dot_dimension_numbers<[1], [0], [0], [1], [0, 0, 1, 1], [], []>} : vector<8x128xbf16>, vector<128x1024xbf16>, vector<8x1024xf32> -> vector<8x1024xf32>
    %c0_3 = arith.constant 0 : index
    %c0_4 = arith.constant 0 : index
    %3 = vector.load %arg3[%c0_3, %c0_4] : memref<1x1024xbf16, #tpu.memory_space<vmem>>, vector<1x1024xbf16>
    %4 = arith.extf %3 : vector<1x1024xbf16> to vector<1x1024xf32>
    %5 = vector.broadcast %4 : vector<1x1024xf32> to vector<8x1024xf32>
    %6 = arith.addf %2, %5 : vector<8x1024xf32>
    %7 = vector.extract_strided_slice %6 {offsets = [0, 0], sizes = [8, 128], strides = [1, 1]} : vector<8x1024xf32> to vector<8x128xf32>
    %8 = vector.extract_strided_slice %6 {offsets = [0, 128], sizes = [8, 128], strides = [1, 1]} : vector<8x1024xf32> to vector<8x128xf32>
    %9 = vector.extract_strided_slice %6 {offsets = [0, 256], sizes = [8, 128], strides = [1, 1]} : vector<8x1024xf32> to vector<8x128xf32>
    %10 = vector.extract_strided_slice %6 {offsets = [0, 384], sizes = [8, 128], strides = [1, 1]} : vector<8x1024xf32> to vector<8x128xf32>
    %11 = vector.extract_strided_slice %6 {offsets = [0, 512], sizes = [8, 128], strides = [1, 1]} : vector<8x1024xf32> to vector<8x128xf32>
    %12 = vector.extract_strided_slice %6 {offsets = [0, 640], sizes = [8, 128], strides = [1, 1]} : vector<8x1024xf32> to vector<8x128xf32>
    %13 = vector.extract_strided_slice %6 {offsets = [0, 768], sizes = [8, 128], strides = [1, 1]} : vector<8x1024xf32> to vector<8x128xf32>
    %14 = vector.extract_strided_slice %6 {offsets = [0, 896], sizes = [8, 128], strides = [1, 1]} : vector<8x1024xf32> to vector<8x128xf32>
    %15 = arith.maximumf %11, %12 : vector<8x128xf32>
    %16 = arith.maximumf %15, %13 : vector<8x128xf32>
    %17 = arith.maximumf %16, %14 : vector<8x128xf32>
    %18 = arith.subf %11, %17 : vector<8x128xf32>
    %19 = math.exp %18 : vector<8x128xf32>
    %20 = arith.subf %12, %17 : vector<8x128xf32>
    %21 = math.exp %20 : vector<8x128xf32>
    %22 = arith.subf %13, %17 : vector<8x128xf32>
    %23 = math.exp %22 : vector<8x128xf32>
    %24 = arith.subf %14, %17 : vector<8x128xf32>
    %25 = math.exp %24 : vector<8x128xf32>
    %26 = arith.addf %19, %21 : vector<8x128xf32>
    %27 = arith.addf %26, %23 : vector<8x128xf32>
    %28 = arith.addf %27, %25 : vector<8x128xf32>
    %29 = tpu.reciprocal %28 {approx = true} : vector<8x128xf32> -> vector<8x128xf32>
    %cst_5 = arith.constant 0.000000e+00 : f32
    %30 = vector.broadcast %cst_5 : f32 to vector<8x128xf32>
    %c0_i32 = arith.constant 0 : i32
    %31 = vector.broadcast %c0_i32 : i32 to vector<8x128xi32>
    %32 = arith.cmpf ogt, %21, %19 : vector<8x128xf32>
    %33 = arith.extui %32 : vector<8x128xi1> to vector<8x128xi32>
    %34 = arith.addi %31, %33 : vector<8x128xi32>
    %35 = arith.cmpf ogt, %23, %19 : vector<8x128xf32>
    %36 = arith.extui %35 : vector<8x128xi1> to vector<8x128xi32>
    %37 = arith.addi %34, %36 : vector<8x128xi32>
    %38 = arith.cmpf ogt, %25, %19 : vector<8x128xf32>
    %39 = arith.extui %38 : vector<8x128xi1> to vector<8x128xi32>
    %40 = arith.addi %37, %39 : vector<8x128xi32>
    %c2_i32 = arith.constant 2 : i32
    %41 = vector.broadcast %c2_i32 : i32 to vector<8x128xi32>
    %42 = arith.cmpi slt, %40, %41 : vector<8x128xi32>
    %43 = arith.mulf %19, %29 : vector<8x128xf32>
    %cst_6 = arith.constant 0.000000e+00 : f32
    %44 = vector.broadcast %cst_6 : f32 to vector<8x128xf32>
    %45 = arith.select %42, %43, %44 : vector<8x128xi1>, vector<8x128xf32>
    %46 = arith.mulf %45, %7 : vector<8x128xf32>
    %47 = arith.addf %30, %46 : vector<8x128xf32>
    %c0_i32_7 = arith.constant 0 : i32
    %48 = vector.broadcast %c0_i32_7 : i32 to vector<8x128xi32>
    %49 = arith.cmpf oge, %19, %21 : vector<8x128xf32>
    %50 = arith.extui %49 : vector<8x128xi1> to vector<8x128xi32>
    %51 = arith.addi %48, %50 : vector<8x128xi32>
    %52 = arith.cmpf ogt, %23, %21 : vector<8x128xf32>
    %53 = arith.extui %52 : vector<8x128xi1> to vector<8x128xi32>
    %54 = arith.addi %51, %53 : vector<8x128xi32>
    %55 = arith.cmpf ogt, %25, %21 : vector<8x128xf32>
    %56 = arith.extui %55 : vector<8x128xi1> to vector<8x128xi32>
    %57 = arith.addi %54, %56 : vector<8x128xi32>
    %c2_i32_8 = arith.constant 2 : i32
    %58 = vector.broadcast %c2_i32_8 : i32 to vector<8x128xi32>
    %59 = arith.cmpi slt, %57, %58 : vector<8x128xi32>
    %60 = arith.mulf %21, %29 : vector<8x128xf32>
    %cst_9 = arith.constant 0.000000e+00 : f32
    %61 = vector.broadcast %cst_9 : f32 to vector<8x128xf32>
    %62 = arith.select %59, %60, %61 : vector<8x128xi1>, vector<8x128xf32>
    %63 = arith.mulf %62, %8 : vector<8x128xf32>
    %64 = arith.addf %47, %63 : vector<8x128xf32>
    %c0_i32_10 = arith.constant 0 : i32
    %65 = vector.broadcast %c0_i32_10 : i32 to vector<8x128xi32>
    %66 = arith.cmpf oge, %19, %23 : vector<8x128xf32>
    %67 = arith.extui %66 : vector<8x128xi1> to vector<8x128xi32>
    %68 = arith.addi %65, %67 : vector<8x128xi32>
    %69 = arith.cmpf oge, %21, %23 : vector<8x128xf32>
    %70 = arith.extui %69 : vector<8x128xi1> to vector<8x128xi32>
    %71 = arith.addi %68, %70 : vector<8x128xi32>
    %72 = arith.cmpf ogt, %25, %23 : vector<8x128xf32>
    %73 = arith.extui %72 : vector<8x128xi1> to vector<8x128xi32>
    %74 = arith.addi %71, %73 : vector<8x128xi32>
    %c2_i32_11 = arith.constant 2 : i32
    %75 = vector.broadcast %c2_i32_11 : i32 to vector<8x128xi32>
    %76 = arith.cmpi slt, %74, %75 : vector<8x128xi32>
    %77 = arith.mulf %23, %29 : vector<8x128xf32>
    %cst_12 = arith.constant 0.000000e+00 : f32
    %78 = vector.broadcast %cst_12 : f32 to vector<8x128xf32>
    %79 = arith.select %76, %77, %78 : vector<8x128xi1>, vector<8x128xf32>
    %80 = arith.mulf %79, %9 : vector<8x128xf32>
    %81 = arith.addf %64, %80 : vector<8x128xf32>
    %c0_i32_13 = arith.constant 0 : i32
    %82 = vector.broadcast %c0_i32_13 : i32 to vector<8x128xi32>
    %83 = arith.cmpf oge, %19, %25 : vector<8x128xf32>
    %84 = arith.extui %83 : vector<8x128xi1> to vector<8x128xi32>
    %85 = arith.addi %82, %84 : vector<8x128xi32>
    %86 = arith.cmpf oge, %21, %25 : vector<8x128xf32>
    %87 = arith.extui %86 : vector<8x128xi1> to vector<8x128xi32>
    %88 = arith.addi %85, %87 : vector<8x128xi32>
    %89 = arith.cmpf oge, %23, %25 : vector<8x128xf32>
    %90 = arith.extui %89 : vector<8x128xi1> to vector<8x128xi32>
    %91 = arith.addi %88, %90 : vector<8x128xi32>
    %c2_i32_14 = arith.constant 2 : i32
    %92 = vector.broadcast %c2_i32_14 : i32 to vector<8x128xi32>
    %93 = arith.cmpi slt, %91, %92 : vector<8x128xi32>
    %94 = arith.mulf %25, %29 : vector<8x128xf32>
    %cst_15 = arith.constant 0.000000e+00 : f32
    %95 = vector.broadcast %cst_15 : f32 to vector<8x128xf32>
    %96 = arith.select %93, %94, %95 : vector<8x128xi1>, vector<8x128xf32>
    %97 = arith.mulf %96, %10 : vector<8x128xf32>
    %98 = arith.addf %81, %97 : vector<8x128xf32>
    %99 = arith.truncf %98 : vector<8x128xf32> to vector<8x128xbf16>
    %c0_16 = arith.constant 0 : index
    %c0_17 = arith.constant 0 : index
    %100 = vector.load %arg4[%c0_16, %c0_17] : memref<8x128xbf16, #tpu.memory_space<vmem>>, vector<8x128xbf16>
    tpu.vector_store %arg4[%c0_16, %c0_17], %99 {strides = array<i32>} : memref<8x128xbf16, #tpu.memory_space<vmem>>, vector<8x128xbf16>,
    return
  }
  func.func @transform_0(%arg0: i32) -> (i32, i32) {
    %c0_i32 = arith.constant 0 : i32
    %c0_i32_0 = arith.constant 0 : i32
    return %arg0, %c0_i32 : i32, i32
  }
  func.func @transform_1(%arg0: i32) -> (i32, i32) {
    %c0_i32 = arith.constant 0 : i32
    %c0_i32_0 = arith.constant 0 : i32
    %c0_i32_1 = arith.constant 0 : i32
    return %c0_i32, %c0_i32_0 : i32, i32
  }
  func.func @transform_2(%arg0: i32) -> (i32, i32) {
    %c0_i32 = arith.constant 0 : i32
    %c0_i32_0 = arith.constant 0 : i32
    %c0_i32_1 = arith.constant 0 : i32
    return %c0_i32, %c0_i32_0 : i32, i32
  }
  func.func @transform_3(%arg0: i32) -> (i32, i32) {
    %c0_i32 = arith.constant 0 : i32
    %c0_i32_0 = arith.constant 0 : i32
    return %arg0, %c0_i32 : i32, i32
  }
}

</mosaic_0001>

<bundles_post_ra>
// kernel: tpu_custom_call.1
= control target key start
LH: loop header
LB: loop body
LE: loop exit
PB: predicated region body
PF: predicated region fallthrough
CT: control target
= control target key end

     0   :  { %8 = vsyncpa [#allocation3], 0  ;;  %s1082_s0 = inlined_call_operand.hbm [shape: bf16[8,128], index: 0, kind: input, shape index: {}]   ;;  %s1083_s1 = inlined_call_operand.hbm [shape: bf16[128,1024], index: 1, kind: input, shape index: {}]   ;;  %s1084_s2 = inlined_call_operand.hbm [shape: bf16[1,1024], index: 2, kind: input, shape index: {}]   ;;  %s1085_s3 = inlined_call_operand.hbm [shape: bf16[8,128], index: 3, kind: output, shape index: {}]  }
   0x1   :  { %9 = vsyncpa [#allocation6], 0 }
   0x2   :  { %10 = vsyncpa [#allocation4], 0  ;;  %s943_s12 = smov [#allocation5]   ;;  %s849_s16 = scalar_lea.hbm %s1083_s1, 8192 }
   0x3   :  { %s26_s13 = sshll.u32 %s943_s12, 4  ;;  %p850_p0 = scmp.ne.s32.totalorder %s1083_s1, %s849_s16  ;;  %s27_s13 = int_to_ptr.vmem [resolvable:$true] %s26_s13 }
   0x4   :  { %p853_p1 = scmp.lt.u32.totalorder %s849_s16, %s1083_s1 }
   0x6   :  { %p855_p2 = pnand %p853_p1, %p850_p0 }
   0x8   :  { %858 = shalt.err (!%p855_p2)
}
   0x9   :  { %s859_s21 = scalar_lea.vmem %s27_s13, 8192  ;;  %p864_p4 = scmp.lt.s32.totalorder %s27_s13, %s27_s13 }
   0xa   :  { %p860_p3 = scmp.ne.s32.totalorder %s27_s13, %s859_s21  ;;  %p865_p5 = scmp.lt.s32.totalorder %s859_s21, %s859_s21 }
   0xc   :  { %p866_p6 = por %p865_p5, %p864_p4 }
   0xe   :  { %p867_p7 = pnand %p866_p6, %p860_p3 }
  0x10   :  { %870 = shalt.err (!%p867_p7)
}
  0x11   :  { %s944_s22 = smov 512   ;;  %s945_s23 = smov 32  }
  0x12   :  { %32 = dma.hbm_to_vmem [thread:$0]  %s1083_s1, 8192, %s27_s13, [#allocation6], %s944_s22, %s944_s22, %s945_s23  }
  0x13   :  { %s946_s26 = smov [#allocation2]   ;;  %s947_s28 = smov [#allocation7]  }
  0x14   :  { %s17_s27 = sshll.u32 %s946_s26, 4  ;;  %s39_s29 = sshll.u32 %s947_s28, 4  ;;  %s18_s27 = int_to_ptr.vmem [resolvable:$true] %s17_s27  ;;  %s40_s29 = int_to_ptr.vmem [resolvable:$true] %s39_s29 }
  0x15   :  { %s871_s5 = scalar_lea.hbm %s1082_s0, 64 }
  0x16   :  { %p872_p8 = scmp.ne.s32.totalorder %s1082_s0, %s871_s5  ;;  %p875_p9 = scmp.lt.u32.totalorder %s871_s5, %s1082_s0 }
  0x18   :  { %p877_p10 = pnand %p875_p9, %p872_p8 }
  0x1a   :  { %880 = shalt.err (!%p877_p10)
}
  0x1b   :  { %s881_s1 = scalar_lea.vmem %s18_s27, 64  ;;  %p886_p12 = scmp.lt.s32.totalorder %s18_s27, %s18_s27 }
  0x1c   :  { %p882_p11 = scmp.ne.s32.totalorder %s18_s27, %s881_s1  ;;  %p887_p13 = scmp.lt.s32.totalorder %s881_s1, %s881_s1 }
  0x1e   :  { %p888_p0 = por %p887_p13, %p886_p12 }
  0x20   :  { %p889_p1 = pnand %p888_p0, %p882_p11 }
  0x22   :  { %892 = shalt.err (!%p889_p1)
}
  0x23   :  { %20 = dma.hbm_to_vmem [thread:$0]  %s1082_s0, 64, %s18_s27, [#allocation3]  }
  0x24   :  { %s893_s14 = scalar_lea.hbm %s1084_s2, 128 }
  0x25   :  { %p894_p2 = scmp.ne.s32.totalorder %s1084_s2, %s893_s14  ;;  %p897_p3 = scmp.lt.u32.totalorder %s893_s14, %s1084_s2 }
  0x27   :  { %p899_p4 = pnand %p897_p3, %p894_p2 }
  0x29   :  { %902 = shalt.err (!%p899_p4)
}
  0x2a   :  { %s903_s19 = scalar_lea.vmem %s40_s29, 128  ;;  %p908_p6 = scmp.lt.s32.totalorder %s40_s29, %s40_s29 }
  0x2b   :  { %p904_p5 = scmp.ne.s32.totalorder %s40_s29, %s903_s19  ;;  %p909_p7 = scmp.lt.s32.totalorder %s903_s19, %s903_s19 }
  0x2d   :  { %p910_p8 = por %p909_p7, %p908_p6 }
  0x2f   :  { %p911_p9 = pnand %p910_p8, %p904_p5 }
  0x31   :  { %914 = shalt.err (!%p911_p9)
}
  0x32   :  { %42 = dma.hbm_to_vmem [thread:$0]  %s1084_s2, 128, %s40_s29, [#allocation6]  }
  0x33   :  { %937 = dma.done.wait [#allocation3], 64  }
  0x34   :  { %938 = vsyncadd [#allocation3], 4294967232 }
  0x35   :  { %939 = dma.done.wait [#allocation6], 8320  }
  0x36   :  { %940 = vsyncadd [#allocation6], 4294958976  ;;  %v948_v0 = vmov 0   ;;  %v54_v1 = vld [vmem:[#allocation5] sm:$0xff]  ;;  %v55_v3 = vld [vmem:[#allocation5 + $0x8] sm:$0xff]  ;;  %s949_s2 = smov [#allocation8]  }
  0x37   :  { %547 = vmatprep.mubr.bf16.mxu0 %v948_v0  ;;  %588 = vmatprep.mubr.bf16.mxu1 %v948_v0  ;;  %v58_v2 = vld [vmem:[#allocation5 + $0x20] sm:$0xff]  ;;  %v59_v5 = vld [vmem:[#allocation5 + $0x28] sm:$0xff]  ;;  %v56_v63 = vld [vmem:[#allocation5 + $0x10] sm:$0xff]  ;;  %s758_s21 = sshll.u32 %s949_s2, 4  ;;  %s759_s21 = int_to_ptr.vmem [resolvable:$true] %s758_s21 }
  0x38   :  { %v769_v4 = vcombine.high %v54_v1, %v58_v2  ;;  %v768_v6 = vcombine.low %v54_v1, %v58_v2  ;;  %v62_v7 = vld [vmem:[#allocation5 + $0x40] sm:$0xff]  ;;  %v771_v9 = vcombine.high %v55_v3, %v59_v5  ;;  %v770_v10 = vcombine.low %v55_v3, %v59_v5  ;;  %v63_v12 = vld [vmem:[#allocation5 + $0x48] sm:$0xff]  ;;  %v60_v1 = vld [vmem:[#allocation5 + $0x30] sm:$0xff]  ;;  %s915_s22 = scalar_lea.vmem %s759_s21, 64  ;;  %p920_p11 = scmp.lt.s32.totalorder %s759_s21, %s759_s21 }
  0x39   :  { %v66_v8 = vld [vmem:[#allocation5 + $0x60] sm:$0xff]  ;;  %v67_v13 = vld [vmem:[#allocation5 + $0x68] sm:$0xff]  ;;  %v57_v2 = vld [vmem:[#allocation5 + $0x18] sm:$0xff]  ;;  %p916_p10 = scmp.ne.s32.totalorder %s759_s21, %s915_s22  ;;  %p921_p12 = scmp.lt.s32.totalorder %s915_s22, %s915_s22 }
  0x3a   :  { %v777_v11 = vcombine.high %v62_v7, %v66_v8  ;;  %v70_v14 = vld [vmem:[#allocation5 + $0x80] sm:$0xff]  ;;  %515 = vmatprep.subr.bf16.mxu0 %v769_v4  ;;  %v779_v15 = vcombine.high %v63_v12, %v67_v13  ;;  %v71_v17 = vld [vmem:[#allocation5 + $0x88] sm:$0xff]  ;;  %556 = vmatprep.subr.bf16.mxu1 %v771_v9  ;;  %v776_v19 = vcombine.low %v62_v7, %v66_v8  ;;  %v61_v3 = vld [vmem:[#allocation5 + $0x38] sm:$0xff] }
  0x3b   :  { %v74_v16 = vld [vmem:[#allocation5 + $0xa0] sm:$0xff]  ;;  %v75_v18 = vld [vmem:[#allocation5 + $0xa8] sm:$0xff]  ;;  %516 = vmatpush1.bf16.msra.mxu0 %v768_v6  ;;  %557 = vmatpush1.bf16.msra.mxu1 %v770_v10  ;;  %v778_v20 = vcombine.low %v63_v12, %v67_v13  ;;  %v773_v6 = vcombine.high %v56_v63, %v60_v1  ;;  %v775_v7 = vcombine.high %v57_v2, %v61_v3  ;;  %v64_v8 = vld [vmem:[#allocation5 + $0x50] sm:$0xff]  ;;  %p922_p13 = por %p921_p12, %p920_p11 }
  0x3c   :  { %517 = vmatprep.subr.bf16.mxu0 %v777_v11  ;;  %v785_v21 = vcombine.high %v70_v14, %v74_v16  ;;  %558 = vmatprep.subr.bf16.mxu1 %v779_v15  ;;  %v787_v22 = vcombine.high %v71_v17, %v75_v18  ;;  %v78_v23 = vld [vmem:[#allocation5 + $0xc0] sm:$0xff]  ;;  %v79_v25 = vld [vmem:[#allocation5 + $0xc8] sm:$0xff]  ;;  %v784_v27 = vcombine.low %v70_v14, %v74_v16  ;;  %v68_v9 = vld [vmem:[#allocation5 + $0x70] sm:$0xff] }
  0x3d   :  { %v82_v24 = vld [vmem:[#allocation5 + $0xe0] sm:$0xff]  ;;  %v83_v26 = vld [vmem:[#allocation5 + $0xe8] sm:$0xff]  ;;  %v786_v28 = vcombine.low %v71_v17, %v75_v18  ;;  %v65_v10 = vld [vmem:[#allocation5 + $0x58] sm:$0xff]  ;;  %v772_v13 = vcombine.low %v56_v63, %v60_v1  ;;  %v774_v14 = vcombine.low %v57_v2, %v61_v3  ;;  %v781_v15 = vcombine.high %v64_v8, %v68_v9  ;;  %p923_p0 = pnand %p922_p13, %p916_p10 }
  0x3e   :  { %v793_v29 = vcombine.high %v78_v23, %v82_v24  ;;  %v795_v30 = vcombine.high %v79_v25, %v83_v26  ;;  %v86_v31 = vld [vmem:[#allocation5 + $0x100] sm:$0xff]  ;;  %v87_v33 = vld [vmem:[#allocation5 + $0x108] sm:$0xff]  ;;  %v792_v35 = vcombine.low %v78_v23, %v82_v24  ;;  %v794_v36 = vcombine.low %v79_v25, %v83_v26  ;;  %v69_v11 = vld [vmem:[#allocation5 + $0x78] sm:$0xff] }
  0x3f   :  { %518 = vmatpush1.bf16.msra.mxu0 %v776_v19  ;;  %559 = vmatpush1.bf16.msra.mxu1 %v778_v20  ;;  %v90_v32 = vld [vmem:[#allocation5 + $0x120] sm:$0xff]  ;;  %v91_v34 = vld [vmem:[#allocation5 + $0x128] sm:$0xff]  ;;  %v1008_v12 = vld [vmem:[#allocation2] sm:$0xf]  ;;  %v783_v16 = vcombine.high %v65_v10, %v69_v11 }
  0x40   :  { %519 = vmatprep.subr.bf16.mxu0 %v785_v21  ;;  %560 = vmatprep.subr.bf16.mxu1 %v787_v22  ;;  %v801_v37 = vcombine.high %v86_v31, %v90_v32  ;;  %v803_v38 = vcombine.high %v87_v33, %v91_v34  ;;  %v94_v39 = vld [vmem:[#allocation5 + $0x140] sm:$0xff]  ;;  %v95_v41 = vld [vmem:[#allocation5 + $0x148] sm:$0xff]  ;;  %v800_v43 = vcombine.low %v86_v31, %v90_v32  ;;  %v72_v17 = vld [vmem:[#allocation5 + $0x90] sm:$0xff] }
  0x41   :  { %v98_v40 = vld [vmem:[#allocation5 + $0x160] sm:$0xff]  ;;  %v99_v42 = vld [vmem:[#allocation5 + $0x168] sm:$0xff]  ;;  %v802_v44 = vcombine.low %v87_v33, %v91_v34  ;;  %v76_v18 = vld [vmem:[#allocation5 + $0xb0] sm:$0xff]  ;;  %v780_v21 = vcombine.low %v64_v8, %v68_v9  ;;  %v782_v22 = vcombine.low %v65_v10, %v69_v11 }
  0x42   :  { %v809_v45 = vcombine.high %v94_v39, %v98_v40  ;;  %v811_v46 = vcombine.high %v95_v41, %v99_v42  ;;  %v102_v47 = vld [vmem:[#allocation5 + $0x180] sm:$0xff]  ;;  %v103_v49 = vld [vmem:[#allocation5 + $0x188] sm:$0xff]  ;;  %v808_v51 = vcombine.low %v94_v39, %v98_v40  ;;  %v810_v52 = vcombine.low %v95_v41, %v99_v42  ;;  %v73_v19 = vld [vmem:[#allocation5 + $0x98] sm:$0xff] }
  0x43   :  { %520 = vmatpush1.bf16.msra.mxu0 %v784_v27  ;;  %561 = vmatpush1.bf16.msra.mxu1 %v786_v28  ;;  %v106_v48 = vld [vmem:[#allocation5 + $0x1a0] sm:$0xff]  ;;  %v107_v50 = vld [vmem:[#allocation5 + $0x1a8] sm:$0xff]  ;;  %v77_v20 = vld [vmem:[#allocation5 + $0xb8] sm:$0xff]  ;;  %v789_v23 = vcombine.high %v72_v17, %v76_v18 }
  0x44   :  { %521 = vmatprep.subr.bf16.mxu0 %v793_v29  ;;  %562 = vmatprep.subr.bf16.mxu1 %v795_v30  ;;  %v817_v53 = vcombine.high %v102_v47, %v106_v48  ;;  %v819_v54 = vcombine.high %v103_v49, %v107_v50  ;;  %v110_v55 = vld [vmem:[#allocation5 + $0x1c0] sm:$0xff]  ;;  %v111_v57 = vld [vmem:[#allocation5 + $0x1c8] sm:$0xff]  ;;  %v816_v59 = vcombine.low %v102_v47, %v106_v48  ;;  %v80_v25 = vld [vmem:[#allocation5 + $0xd0] sm:$0xff] }
  0x45   :  { %v114_v56 = vld [vmem:[#allocation5 + $0x1e0] sm:$0xff]  ;;  %v115_v58 = vld [vmem:[#allocation5 + $0x1e8] sm:$0xff]  ;;  %v818_v60 = vcombine.low %v103_v49, %v107_v50  ;;  %v791_v24 = vcombine.high %v73_v19, %v77_v20  ;;  %v84_v26 = vld [vmem:[#allocation5 + $0xf0] sm:$0xff]  ;;  %v788_v29 = vcombine.low %v72_v17, %v76_v18  ;;  %v790_v30 = vcombine.low %v73_v19, %v77_v20 }
  0x46   :  { %v825_v61 = vcombine.high %v110_v55, %v114_v56  ;;  %v827_v62 = vcombine.high %v111_v57, %v115_v58  ;;  %v824_v4 = vcombine.low %v110_v55, %v114_v56  ;;  %v826_v5 = vcombine.low %v111_v57, %v115_v58  ;;  %v81_v27 = vld [vmem:[#allocation5 + $0xd8] sm:$0xff]  ;;  %v88_v33 = vld [vmem:[#allocation5 + $0x110] sm:$0xff] }
  0x47   :  { %522 = vmatpush1.bf16.msra.mxu0 %v792_v35  ;;  %563 = vmatpush1.bf16.msra.mxu1 %v794_v36  ;;  %v85_v28 = vld [vmem:[#allocation5 + $0xf8] sm:$0xff]  ;;  %v797_v31 = vcombine.high %v80_v25, %v84_v26  ;;  %v92_v34 = vld [vmem:[#allocation5 + $0x130] sm:$0xff] }
  0x48   :  { %523 = vmatprep.subr.bf16.mxu0 %v801_v37  ;;  %564 = vmatprep.subr.bf16.mxu1 %v803_v38  ;;  %v799_v32 = vcombine.high %v81_v27, %v85_v28  ;;  %v89_v35 = vld [vmem:[#allocation5 + $0x118] sm:$0xff]  ;;  %v796_v37 = vcombine.low %v80_v25, %v84_v26  ;;  %v798_v38 = vcombine.low %v81_v27, %v85_v28  ;;  %v96_v41 = vld [vmem:[#allocation5 + $0x150] sm:$0xff] }
  0x49   :  { %v93_v36 = vld [vmem:[#allocation5 + $0x138] sm:$0xff]  ;;  %v805_v39 = vcombine.high %v88_v33, %v92_v34  ;;  %v100_v42 = vld [vmem:[#allocation5 + $0x170] sm:$0xff] }
  0x4a   :  { %v807_v40 = vcombine.high %v89_v35, %v93_v36  ;;  %v813_v47 = vcombine.high %v96_v41, %v100_v42  ;;  %v104_v49 = vld [vmem:[#allocation5 + $0x190] sm:$0xff] }
  0x4b   :  { %524 = vmatpush1.bf16.msra.mxu0 %v800_v43  ;;  %565 = vmatpush1.bf16.msra.mxu1 %v802_v44  ;;  %v97_v43 = vld [vmem:[#allocation5 + $0x158] sm:$0xff]  ;;  %v108_v50 = vld [vmem:[#allocation5 + $0x1b0] sm:$0xff] }
  0x4c   :  { %525 = vmatprep.subr.bf16.mxu0 %v809_v45  ;;  %566 = vmatprep.subr.bf16.mxu1 %v811_v46  ;;  %v101_v44 = vld [vmem:[#allocation5 + $0x178] sm:$0xff]  ;;  %v804_v45 = vcombine.low %v88_v33, %v92_v34  ;;  %v806_v46 = vcombine.low %v89_v35, %v93_v36  ;;  %v821_v55 = vcombine.high %v104_v49, %v108_v50  ;;  %v112_v57 = vld [vmem:[#allocation5 + $0x1d0] sm:$0xff] }
  0x4d   :  { %v815_v48 = vcombine.high %v97_v43, %v101_v44  ;;  %v116_v58 = vld [vmem:[#allocation5 + $0x1f0] sm:$0xff] }
  0x4e   :  { %v829_v63 = vcombine.high %v112_v57, %v116_v58  ;;  %v828_v2 = vcombine.low %v112_v57, %v116_v58 }
  0x4f   :  { %526 = vmatpush1.bf16.msra.mxu0 %v808_v51  ;;  %567 = vmatpush1.bf16.msra.mxu1 %v810_v52  ;;  %v105_v51 = vld [vmem:[#allocation5 + $0x198] sm:$0xff] }
  0x50   :  { %527 = vmatprep.subr.bf16.mxu0 %v817_v53  ;;  %568 = vmatprep.subr.bf16.mxu1 %v819_v54  ;;  %v109_v52 = vld [vmem:[#allocation5 + $0x1b8] sm:$0xff]  ;;  %v812_v53 = vcombine.low %v96_v41, %v100_v42  ;;  %v814_v54 = vcombine.low %v97_v43, %v101_v44 }
  0x51   :  { %v823_v56 = vcombine.high %v105_v51, %v109_v52 }
  0x53   :  { %528 = vmatpush1.bf16.msra.mxu0 %v816_v59  ;;  %569 = vmatpush1.bf16.msra.mxu1 %v818_v60  ;;  %v113_v59 = vld [vmem:[#allocation5 + $0x1d8] sm:$0xff] }
  0x54   :  { %529 = vmatprep.subr.bf16.mxu0 %v825_v61  ;;  %570 = vmatprep.subr.bf16.mxu1 %v827_v62  ;;  %v117_v60 = vld [vmem:[#allocation5 + $0x1f8] sm:$0xff]  ;;  %v820_v61 = vcombine.low %v104_v49, %v108_v50  ;;  %v822_v62 = vcombine.low %v105_v51, %v109_v52 }
  0x55   :  { %v831_v1 = vcombine.high %v113_v59, %v117_v60  ;;  %v830_v3 = vcombine.low %v113_v59, %v117_v60 }
  0x57   :  { %530 = vmatpush1.bf16.msra.mxu0 %v824_v4  ;;  %571 = vmatpush1.bf16.msra.mxu1 %v826_v5 }
  0x58   :  { %597 = vmatprep.subr.bf16.mxu0 %v773_v6  ;;  %638 = vmatprep.subr.bf16.mxu1 %v775_v7 }
  0x5a   :  { %548 = vmatmul.mubr.bf16.vlgmr.msra.gmra.mrb[0].mxu0 %v1008_v12  ;;  %589 = vmatmul.mubr.bf16.vlgmr.msra.gmra.mrb[0].mxu1 %v1008_v12 }
  0x5b   :  { %598 = vmatpush1.bf16.msra.mxu0 %v772_v13  ;;  %639 = vmatpush1.bf16.msra.mxu1 %v774_v14  ;;  %v123_v13 = vlaneseq }
  0x5c   :  { %599 = vmatprep.subr.bf16.mxu0 %v781_v15  ;;  %640 = vmatprep.subr.bf16.mxu1 %v783_v16  ;;  %v118_v15 = vld [vmem:[#allocation7] sm:$0xff] }
  0x5d   :  { %629 = vmatprep.mubr.bf16.mxu0 %v948_v0  ;;  %670 = vmatprep.mubr.bf16.mxu1 %v948_v0  ;;  %v1024_v14 = vshrl.u32 %v123_v13, 7  ;;  %v120_v16 = vunpack.c.h.bf16 %v118_v15  ;;  %v119_v51 = vunpack.c.l.bf16 %v118_v15 }
  0x5f   :  { %600 = vmatpush1.bf16.msra.mxu0 %v780_v21  ;;  %641 = vmatpush1.bf16.msra.mxu1 %v782_v22  ;;  %v1027_v17 = vsub.s32 0, %v1024_v14  ;;  %v133_v18 = vsub.s32 4, %v1024_v14  ;;  %v137_v22 = vsub.s32 6, %v1024_v14 }
  0x60   :  { %601 = vmatprep.subr.bf16.mxu0 %v789_v23  ;;  %642 = vmatprep.subr.bf16.mxu1 %v791_v24 }
  0x61   :  { %v142_v19 = vrot.slane %v120_v16, %v1027_v17  ;;  %v150_v20 = vrot.slane %v120_v16, %v133_v18  ;;  %v154_v26 = vrot.slane %v120_v16, %v137_v22 }
  0x63   :  { %602 = vmatpush1.bf16.msra.mxu0 %v788_v29  ;;  %643 = vmatpush1.bf16.msra.mxu1 %v790_v30  ;;  %v182_v23 = vrot.slane %v142_v19, %v1027_v17  ;;  %v190_v24 = vrot.slane %v150_v20, %v1027_v17  ;;  %v194_v33 = vrot.slane %v154_v26, %v1027_v17 }
  0x64   :  { %603 = vmatprep.subr.bf16.mxu0 %v797_v31  ;;  %644 = vmatprep.subr.bf16.mxu1 %v799_v32  ;;  %v134_v19 = vrot.slane %v119_v51, %v133_v18 }
  0x66   :  { %v174_v18 = vrot.slane %v134_v19, %v1027_v17 }
  0x67   :  { %604 = vmatpush1.bf16.msra.mxu0 %v796_v37  ;;  %645 = vmatpush1.bf16.msra.mxu1 %v798_v38 }
  0x68   :  { %605 = vmatprep.subr.bf16.mxu0 %v805_v39  ;;  %646 = vmatprep.subr.bf16.mxu1 %v807_v40 }
  0x6b   :  { %606 = vmatpush1.bf16.msra.mxu0 %v804_v45  ;;  %647 = vmatpush1.bf16.msra.mxu1 %v806_v46 }
  0x6c   :  { %607 = vmatprep.subr.bf16.mxu0 %v813_v47  ;;  %648 = vmatprep.subr.bf16.mxu1 %v815_v48 }
  0x6f   :  { %608 = vmatpush1.bf16.msra.mxu0 %v812_v53  ;;  %649 = vmatpush1.bf16.msra.mxu1 %v814_v54 }
  0x70   :  { %609 = vmatprep.subr.bf16.mxu0 %v821_v55  ;;  %650 = vmatprep.subr.bf16.mxu1 %v823_v56  ;;  %v126_v55 = vrot.slane %v119_v51, %v1027_v17 }
  0x73   :  { %610 = vmatpush1.bf16.msra.mxu0 %v820_v61  ;;  %651 = vmatpush1.bf16.msra.mxu1 %v822_v62 }
  0x74   :  { %611 = vmatprep.subr.bf16.mxu0 %v829_v63  ;;  %652 = vmatprep.subr.bf16.mxu1 %v831_v1 }
  0x77   :  { %612 = vmatpush1.bf16.msra.mxu0 %v828_v2  ;;  %653 = vmatpush1.bf16.msra.mxu1 %v830_v3 }
  0x7a   :  { %630 = vmatmul.mubr.bf16.vlgmr.msra.gmra.mrb[4].mxu0 %v1008_v12  ;;  %671 = vmatmul.mubr.bf16.vlgmr.msra.gmra.mrb[4].mxu1 %v1008_v12  ;;  %v129_v12 = vsub.s32 2, %v1024_v14 }
  0x7c   :  { %v146_v21 = vrot.slane %v120_v16, %v129_v12  ;;  %v130_v16 = vrot.slane %v119_v51, %v129_v12 }
  0x7e   :  { %v186_v25 = vrot.slane %v146_v21, %v1027_v17 }
 0x12d   :  { %v1016_v4 = vpop.f32.mrb[0].mxu0  ;;  %v1020_v6 = vpop.f32.mrb[0].mxu1 }
 0x12e   :  { %v1018_v5 = vpop.f32.mrb[1].mxu0  ;;  %v1022_v8 = vpop.f32.mrb[1].mxu1 }
 0x12f   :  { %v553_v7 = vpop.f32.mrb[2].mxu0  ;;  %v594_v10 = vpop.f32.mrb[2].mxu1 }
 0x130   :  { %v554_v9 = vpop.f32.mrb[3].mxu0  ;;  %v595_v11 = vpop.f32.mrb[3].mxu1 }
 0x14d   :  { %v631_v27 = vpop.f32.mrb[4].mxu0  ;;  %v672_v29 = vpop.f32.mrb[4].mxu1 }
 0x14e   :  { %v632_v28 = vadd.f32 %v631_v27, %v182_v23  ;;  %v633_v30 = vpop.f32.mrb[5].mxu0  ;;  %v673_v31 = vadd.f32 %v672_v29, %v190_v24  ;;  %v674_v34 = vpop.f32.mrb[5].mxu1  ;;  %v138_v23 = vrot.slane %v119_v51, %v137_v22  ;;  %v166_v27 = vrot.slane %v126_v55, %v1027_v17 }
 0x14f   :  { %v634_v32 = vadd.f32 %v633_v30, %v186_v25  ;;  %v635_v35 = vpop.f32.mrb[6].mxu0  ;;  %v676_v36 = vpop.f32.mrb[6].mxu1  ;;  %v675_v40 = vadd.f32 %v674_v34, %v194_v33 }
 0x150   :  { %v636_v37 = vpop.f32.mrb[7].mxu0  ;;  %v677_v39 = vpop.f32.mrb[7].mxu1  ;;  %v178_v29 = vrot.slane %v138_v23, %v1027_v17  ;;  %v550_v14 = vadd.f32 %v1016_v4, %v166_v27 }
 0x151   :  { %v679_v38 = vmax.f32 %v632_v28, %v634_v32 }
 0x152   :  { %v593_v33 = vadd.f32 %v1022_v8, %v178_v29 }
 0x153   :  { %v680_v41 = vmax.f32 %v679_v38, %v673_v31 }
 0x155   :  { %v681_v42 = vmax.f32 %v680_v41, %v675_v40 }
 0x157   :  { %v682_v43 = vsub.f32 %v632_v28, %v681_v42  ;;  %v685_v44 = vsub.f32 %v634_v32, %v681_v42  ;;  %v688_v45 = vsub.f32 %v673_v31, %v681_v42  ;;  %v691_v46 = vsub.f32 %v675_v40, %v681_v42 }
 0x158   :  { %v170_v28 = vrot.slane %v130_v16, %v1027_v17  ;;  %v591_v32 = vadd.f32 %v1020_v6, %v174_v18 }
 0x159   :  { %v683_v47 = vmul.f32 1.442695, %v682_v43  ;;  %v686_v48 = vmul.f32 1.442695, %v685_v44  ;;  %v689_v49 = vmul.f32 1.442695, %v688_v45 }
 0x15a   :  { %v692_v50 = vmul.f32 1.442695, %v691_v46  ;;  %v552_v22 = vadd.f32 %v1018_v5, %v170_v28 }
 0x15b   :  { %839 = vpow2.f32 %v683_v47 }
 0x15c   :  { %841 = vpow2.f32 %v686_v48 }
 0x15d   :  { %843 = vpow2.f32 %v689_v49 }
 0x15e   :  { %845 = vpow2.f32 %v692_v50 }
 0x165   :  { %v840_v52 = vpop.eup %839 }
 0x166   :  { %v842_v53 = vpop.eup %841 }
 0x167   :  { %v844_v54 = vpop.eup %843  ;;  %v694_v56 = vadd.f32 %v842_v53, %v840_v52  ;;  %vm698_vm0 = vcmp.gt.f32.partialorder %v842_v53, %v840_v52  ;;  %vm711_vm1 = vcmp.ge.f32.partialorder %v840_v52, %v842_v53 }
 0x168   :  { %v846_v57 = vpop.eup %845  ;;  %v699_v58 = vsel %vm698_vm0, 1, %v948_v0  ;;  %vm700_vm2 = vcmp.gt.f32.partialorder %v844_v54, %v840_v52  ;;  %v712_v59 = vsel %vm711_vm1, 1, %v948_v0  ;;  %vm713_vm3 = vcmp.gt.f32.partialorder %v844_v54, %v842_v53 }
 0x169   :  { %v695_v60 = vadd.f32 %v844_v54, %v694_v56  ;;  %v701_v61 = vsel %vm700_vm2, 1, %v948_v0  ;;  %vm703_vm4 = vcmp.gt.f32.partialorder %v846_v57, %v840_v52  ;;  %v714_v62 = vsel %vm713_vm3, 1, %v948_v0 }
 0x16a   :  { %v702_v63 = vadd.s32 %v701_v61, %v699_v58  ;;  %v704_v1 = vsel %vm703_vm4, 1, %v948_v0  ;;  %v715_v2 = vadd.s32 %v714_v62, %v712_v59  ;;  %vm716_vm5 = vcmp.gt.f32.partialorder %v846_v57, %v842_v53 }
 0x16b   :  { %v696_v3 = vadd.f32 %v846_v57, %v695_v60  ;;  %v717_v7 = vsel %vm716_vm5, 1, %v948_v0  ;;  %vm724_vm6 = vcmp.ge.f32.partialorder %v840_v52, %v844_v54  ;;  %vm726_vm7 = vcmp.ge.f32.partialorder %v842_v53, %v844_v54 }
 0x16c   :  { %v705_v9 = vadd.s32 %v704_v1, %v702_v63  ;;  %v718_v10 = vadd.s32 %v717_v7, %v715_v2  ;;  %v725_v11 = vsel %vm724_vm6, 1, %v948_v0  ;;  %v727_v13 = vsel %vm726_vm7, 1, %v948_v0 }
 0x16d   :  { %847 = vrcp.f32 %v696_v3  ;;  %v728_v15 = vadd.s32 %v727_v13, %v725_v11  ;;  %vm729_vm8 = vcmp.gt.f32.partialorder %v846_v57, %v844_v54  ;;  %vm737_vm9 = vcmp.ge.f32.partialorder %v840_v52, %v846_v57 }
 0x16e   :  { %v730_v20 = vsel %vm729_vm8, 1, %v948_v0  ;;  %v738_v21 = vsel %vm737_vm9, 1, %v948_v0  ;;  %vm739_vm10 = vcmp.ge.f32.partialorder %v842_v53, %v846_v57  ;;  %vm742_vm11 = vcmp.ge.f32.partialorder %v844_v54, %v846_v57 }
 0x16f   :  { %v731_v24 = vadd.s32 %v730_v20, %v728_v15  ;;  %v740_v25 = vsel %vm739_vm10, 1, %v948_v0  ;;  %v743_v12 = vsel %vm742_vm11, 1, %v948_v0  ;;  %vm706_vm12 = vcmp.lt.s32.totalorder %v705_v9, 2 }
 0x170   :  { %v741_v26 = vadd.s32 %v740_v25, %v738_v21  ;;  %vm719_vm13 = vcmp.lt.s32.totalorder %v718_v10, 2 }
 0x171   :  { %vm732_vm14 = vcmp.lt.s32.totalorder %v731_v24, 2 }
 0x172   :  { %v744_v30 = vadd.s32 %v743_v12, %v741_v26 }
 0x174   :  { %vm745_vm15 = vcmp.lt.s32.totalorder %v744_v30, 2 }
 0x177   :  { %v848_v31 = vpop.eup %847 }
 0x178   :  { %v707_v34 = vmul.f32 %v848_v31, %v840_v52  ;;  %v720_v35 = vmul.f32 %v848_v31, %v842_v53  ;;  %v733_v36 = vmul.f32 %v848_v31, %v844_v54  ;;  %v746_v0 = vmul.f32 %v848_v31, %v846_v57 }
 0x17a   :  { %v708_v37 = vsel %vm706_vm12, %v707_v34, 0.0  ;;  %v721_v17 = vsel %vm719_vm13, %v720_v35, 0.0  ;;  %v734_v38 = vsel %vm732_vm14, %v733_v36, 0.0  ;;  %v747_v39 = vsel %vm745_vm15, %v746_v0, 0.0 }
 0x17b   :  { %v709_v40 = vmul.f32 %v708_v37, %v550_v14  ;;  %v722_v4 = vmul.f32 %v721_v17, %v552_v22  ;;  %v735_v41 = vmul.f32 %v734_v38, %v591_v32  ;;  %v748_v5 = vmul.f32 %v747_v39, %v593_v33 }
 0x17d   :  { %v723_v42 = vadd.f32 %v722_v4, %v709_v40 }
 0x17f   :  { %v736_v6 = vadd.f32 %v735_v41, %v723_v42 }
 0x181   :  { %v749_v8 = vadd.f32 %v748_v5, %v736_v6 }
 0x183   :  { %v750_v43 = vpack.c.bf16 %v749_v8, %v749_v8 }
 0x185   :  { %751 = vst [vmem:[#allocation8] sm:$0xf] %v750_v43 }
 0x186   :  { %926 = shalt.err (!%p923_p0)
}
 0x187   :  { %s927_s25 = scalar_lea.hbm %s1085_s3, 64 }
 0x188   :  { %p928_p1 = scmp.ne.s32.totalorder %s1085_s3, %s927_s25  ;;  %p931_p2 = scmp.lt.u32.totalorder %s927_s25, %s1085_s3 }
 0x18a   :  { %p933_p3 = pnand %p931_p2, %p928_p1 }
 0x18c   :  { %936 = shalt.err (!%p933_p3)
}
 0x18d   :  { %761 = dma.vmem_to_hbm [thread:$0]  %s759_s21, 64, %s1085_s3, [#allocation4]  }
 0x18e   :  { %941 = dma.done.wait [#allocation4], 64  }
 0x18f   :  { %942 = vsyncadd [#allocation4], 4294967232 }
 0x190   :  { %765 = vsyncpa [#allocation3], 1 }
 0x191   :  { %766 = vsyncpa [#allocation6], 1 }
 0x192   :  { %767 = vsyncpa [#allocation4], 1 }

</bundles_post_ra>
